<compile_context>
chip_gen: v5e
topology: v5e:2x2
jax: 0.10.0
libtpu: 0.0.40
codegen_flags: <defaults>
</compile_context>

<pallas_src>
import jax
import jax.numpy as jnp
from jax.experimental import pallas as pl
from jax.experimental.pallas import tpu as pltpu


def _copy_kernel(x_ref, o_ref):
    # Trivial elementwise pass-through on the VPU; stands in for the (absent)
    # output-layer compute of CNN_final.
    o_ref[...] = x_ref[...]


def pallas_identity(x: jax.Array, *, max_tile_bytes: int = 4 * 1024 * 1024) -> jax.Array:
    """Identity copy through VMEM demonstrating pallas_call plumbing.

    The output aliases the input HBM buffer (input_output_aliases), and tiling
    is chosen so small arrays go through as a single block while large ones use
    the biggest 8-row-aligned tile that fits the per-buffer VMEM budget.
    The last (lane) dimension is always kept full-width and lane-dense.
    """
    rows, cols = x.shape
    bytes_per_row = cols * x.dtype.itemsize

    # Largest row-tile under the per-buffer budget, rounded down to a sublane
    # multiple of 8; fall back to the full array (always a legal block shape).
    budget_rows = (max_tile_bytes // max(bytes_per_row, 1)) // 8 * 8
    if budget_rows >= rows or budget_rows < 8:
        tile_rows = rows          # single block covers the whole array
    else:
        tile_rows = budget_rows

    grid = (pl.cdiv(rows, tile_rows),)
    return pl.pallas_call(
        _copy_kernel,
        out_shape=jax.ShapeDtypeStruct((rows, cols), x.dtype),
        grid=grid,
        in_specs=[pl.BlockSpec((tile_rows, cols), lambda i: (i, 0))],
        out_specs=pl.BlockSpec((tile_rows, cols), lambda i: (i, 0)),
        input_output_aliases={0: 0},   # identity: reuse the input HBM buffer
        compiler_params=pltpu.CompilerParams(
            dimension_semantics=("arbitrary",),
            # Portable across v5e/v6e (128 MiB phys) and v7x (64 MiB phys);
            # raises v5e's 16 MiB scoped default so bigger tiles are allowed.
            vmem_limit_bytes=32 * 1024 * 1024,
        ),
    )(x)


# Donate the input so the input_output_alias is honored without a defensive copy.
_pallas_identity_donated = jax.jit(pallas_identity, donate_argnums=0)


class CNNFinal:
    """JAX/Pallas counterpart of CNN_final.

    The PyTorch module defines no parameters and an empty forward, so this
    class holds no weights and `forward()` returns None, matching the
    reference semantics exactly.
    """

    def __init__(self):
        # Reference __init__ is `pass`: no parameters to initialize.
        pass

    def forward(self):
        # Reference forward is `pass` (returns None).
        # TODO(synk): no computation defined in the reference module.
        return None

    __call__ = forward


if __name__ == "__main__":
    # Instantiate the (empty) module and run its forward, mirroring PyTorch.
    model = CNNFinal()
    result = model()
    assert result is None  # matches `def forward(self) -> Tensor: pass`

    # Exercise the Pallas kernel path once so the TPU lowering is validated.
    key = jax.random.PRNGKey(0)
    x = jax.random.normal(key, (16, 128), dtype=jnp.float32)  # small lane-dense tile
    # Separate (regenerated) buffer so we can donate it and still compare to x.
    x_in = jax.random.normal(key, (16, 128), dtype=jnp.float32)
    y = _pallas_identity_donated(x_in)
    jax.block_until_ready(y)
    assert y.shape == x.shape and y.dtype == x.dtype
    assert bool(jnp.allclose(y, x))

    # Also exercise the multi-block path (forced small budget -> grid > 1).
    key2 = jax.random.PRNGKey(0)
    x2 = jax.random.normal(key2, (64, 256), dtype=jnp.float32)
    y2 = pallas_identity(x2, max_tile_bytes=16 * 1024)  # 16 KiB budget -> 16-row tiles
    jax.block_until_ready(y2)
    assert bool(jnp.allclose(y2, x2))

    print("KERNEL_OK")
</pallas_src>

<mosaic_0001>
module attributes {stable_mosaic.version = 11 : i64} {
  func.func @_copy_kernel(%arg0: i32, %arg1: memref<16x128xf32, #tpu.memory_space<vmem>>, %arg2: memref<16x128xf32, #tpu.memory_space<vmem>>) attributes {dimension_semantics = [#tpu.dimension_semantics<arbitrary>], iteration_bounds = array<i64: 1>, scalar_prefetch = 0 : i64, scratch_operands = 0 : i64, tpu.core_type = #tpu.core_type<tc>, window_params = [{transform_indices = @transform_0, window_bounds = array<i64: 16, 128>}, {transform_indices = @transform_1, window_bounds = array<i64: 16, 128>}]} {
    %c0 = arith.constant 0 : index
    %c0_0 = arith.constant 0 : index
    %0 = vector.load %arg1[%c0, %c0_0] : memref<16x128xf32, #tpu.memory_space<vmem>>, vector<16x128xf32>
    %c0_1 = arith.constant 0 : index
    %c0_2 = arith.constant 0 : index
    %1 = vector.load %arg2[%c0_1, %c0_2] : memref<16x128xf32, #tpu.memory_space<vmem>>, vector<16x128xf32>
    tpu.vector_store %arg2[%c0_1, %c0_2], %0 {strides = array<i32>} : memref<16x128xf32, #tpu.memory_space<vmem>>, vector<16x128xf32>,
    return
  }
  func.func @transform_0(%arg0: i32) -> (i32, i32) {
    %c0_i32 = arith.constant 0 : i32
    %c0_i32_0 = arith.constant 0 : i32
    return %arg0, %c0_i32 : i32, i32
  }
  func.func @transform_1(%arg0: i32) -> (i32, i32) {
    %c0_i32 = arith.constant 0 : i32
    %c0_i32_0 = arith.constant 0 : i32
    return %arg0, %c0_i32 : i32, i32
  }
}

</mosaic_0001>

<bundles_post_ra>
// kernel: pallas_identity.1
= control target key start
LH: loop header
LB: loop body
LE: loop exit
PB: predicated region body
PF: predicated region fallthrough
CT: control target
= control target key end

     0   :  { %6 = vsyncpa [#allocation3], 0  ;;  %s124_s0 = inlined_call_operand.hbm [shape: f32[16,128], index: 0, kind: input, shape index: {}, may-alias: {0,1}]   ;;  %s125_s1 = inlined_call_operand.hbm [shape: f32[16,128], index: 1, kind: output, shape index: {}, may-alias: {0,1}]  }
   0x1   :  { %7 = vsyncpa [#allocation4], 0  ;;  %s12_s8 = sshll.u32 %s124_s0, 4  ;;  %s104_s9 = smov [#allocation2]   ;;  %s13_s8 = int_to_ptr.hbm [resolvable:$true] %s12_s8 }
   0x2   :  { %s14_s10 = sshll.u32 %s104_s9, 4  ;;  %s105_s11 = smov 128   ;;  %s15_s10 = int_to_ptr.vmem [resolvable:$true] %s14_s10 }
   0x3   :  { %s106_s12 = smov 8  }
   0x4   :  { %20 = dma.hbm_to_vmem [thread:$0]  %s13_s8, 256, %s15_s10, [#allocation3], %s105_s11, %s105_s11, %s106_s12  }
   0x5   :  { %100 = dma.done.wait [#allocation3], 256  }
   0x6   :  { %101 = vsyncadd [#allocation3], 4294967040  ;;  %s107_s13 = smov [#allocation5]   ;;  %s35_s17 = sshll.u32 %s125_s1, 4  ;;  %v25_v0 = vld [vmem:[#allocation2] sm:$0xff]  ;;  %v26_v1 = vld [vmem:[#allocation2 + $0x8] sm:$0xff]  ;;  %s36_s17 = int_to_ptr.hbm [resolvable:$true] %s35_s17 }
   0x7   :  { %s33_s14 = sshll.u32 %s107_s13, 4  ;;  %27 = vst [vmem:[#allocation5] sm:$0xff] %v25_v0  ;;  %s34_s14 = int_to_ptr.vmem [resolvable:$true] %s33_s14 }
   0x8   :  { %28 = vst [vmem:[#allocation5 + $0x8] sm:$0xff] %v26_v1 }
   0x9   :  { %41 = dma.vmem_to_hbm [thread:$0]  %s34_s14, 256, %s36_s17, [#allocation4], %s105_s11, %s105_s11, %s106_s12  }
   0xa   :  { %102 = dma.done.wait [#allocation4], 256  }
   0xb   :  { %103 = vsyncadd [#allocation4], 4294967040 }
   0xc   :  { %46 = vsyncpa [#allocation3], 1 }
   0xd   :  { %47 = vsyncpa [#allocation4], 1 }

</bundles_post_ra>
